<compile_context>
chip_gen: v6e
topology: v6e:2x2x1
jax: 0.10.0
libtpu: 0.0.40
codegen_flags: <defaults>
</compile_context>

<pallas_src>
import functools

import jax
import jax.numpy as jnp
from jax.experimental import pallas as pl
from jax.experimental.pallas import tpu as pltpu


def _decoder_embed_kernel(ids_ref, resp_tbl_ref, pos_ref, out_ref):
    """ids_ref:  (tm, 1)  int32   — response ids for this row tile (VMEM)
       resp_tbl_ref: (n_resp, D)  — full response embedding table (VMEM resident)
       pos_ref:  (tm, D)          — positional embedding tile (same block for all batches)
       out_ref:  (tm, D)          — output tile
    """
    ids = ids_ref[...]                                  # (tm, 1) int32
    tbl = resp_tbl_ref[...].astype(jnp.float32)         # (n_resp, D), tiny, resident
    tm = ids.shape[0]
    n_resp, d = tbl.shape

    # Unrolled VPU compare-select gather (small vocab). Out-of-range / negative ids
    # silently produce a zero embedding (PyTorch nn.Embedding would raise).
    e = jnp.zeros((tm, d), jnp.float32)
    for v in range(n_resp):                             # static unroll, n_resp is small
        e = jnp.where(ids == v, tbl[v:v + 1, :], e)

    out_ref[...] = (pos_ref[...].astype(jnp.float32) + e).astype(out_ref.dtype)


def _pick_row_tile(seq_len, n_dims):
    """Largest row tile that divides seq_len and keeps ~6 live (tm, D) f32 buffers
    well under the VMEM scoped budget (measured sweet spot ~512-1024 rows)."""
    lane_padded_d = -(-n_dims // 128) * 128
    budget = 24 * 1024 * 1024
    for cand in (2048, 1024, 512, 256, 128, 64, 32, 16, 8):
        if seq_len % cand == 0 and 6 * cand * lane_padded_d * 4 <= budget:
            return cand
    return seq_len


def _padded_tile_bytes(rows, cols, itemsize=4):
    return (-(-rows // 8) * 8) * (-(-cols // 128) * 128) * itemsize


@functools.partial(jax.jit, static_argnames=())
def decoder_embedding(responses, resp_table, pos_table):
    """responses: (B, S) int32; resp_table: (n_responses, D); pos_table: (S, D).
    Returns (B, S, D) float32 = position_embed + response_embed(responses)."""
    B, S = responses.shape
    n_resp, D = resp_table.shape
    assert pos_table.shape == (S, D)

    tm = _pick_row_tile(S, D)
    rows = B * S
    n_tiles = rows // tm
    s_blocks = S // tm                      # pos table blocks per sequence

    ids_flat = responses.reshape(rows, 1).astype(jnp.int32)   # glue reshape

    # VMEM budget: double-buffered ids/pos/out tiles + the resident table (x2 margin).
    vmem_bytes = (
        2 * _padded_tile_bytes(tm, 1)
        + 2 * _padded_tile_bytes(n_resp, D)
        + 2 * _padded_tile_bytes(tm, D)
        + 2 * _padded_tile_bytes(tm, D)
    )
    vmem_limit = int(min(max(2 * vmem_bytes, 4 << 20), 100 << 20))

    out_flat = pl.pallas_call(
        _decoder_embed_kernel,
        out_shape=jax.ShapeDtypeStruct((rows, D), jnp.float32),
        grid=(n_tiles,),
        in_specs=[
            # ids: one (tm, 1) block per row tile.
            pl.BlockSpec((tm, 1), lambda t: (t, 0)),
            # response table: constant block index -> fetched once, stays resident.
            pl.BlockSpec((n_resp, D), lambda t: (0, 0)),
            # positional tile: same S-block for every batch (no jnp.tile / duplication).
            pl.BlockSpec((tm, D), lambda t: (t % s_blocks, 0)),
        ],
        out_specs=pl.BlockSpec((tm, D), lambda t: (t, 0)),
        compiler_params=pltpu.CompilerParams(
            dimension_semantics=("parallel",),
            vmem_limit_bytes=vmem_limit,
        ),
    )(ids_flat, resp_table, pos_table)

    return out_flat.reshape(B, S, D)


if __name__ == "__main__":
    # Small, forward-consistent shapes.
    batch = 2
    seq_len = 8
    n_dims = 32
    n_responses = 4

    key = jax.random.PRNGKey(0)
    k_resp, k_pos, k_time, k_ids = jax.random.split(key, 4)

    # Deterministic parameter init (nn.Embedding default: N(0, 1)).
    resp_table = jax.random.normal(k_resp, (n_responses, n_dims), dtype=jnp.float32)
    pos_table = jax.random.normal(k_pos, (seq_len, n_dims), dtype=jnp.float32)
    # time_embed weight: Linear(1, n_dims, bias=False) -> (n_dims, 1); unused in forward.
    time_embed_w = jax.random.uniform(k_time, (n_dims, 1), minval=-1.0, maxval=1.0)
    del time_embed_w  # present in __init__, never used by forward()

    responses = jax.random.randint(k_ids, (batch, seq_len), 0, n_responses,
                                   dtype=jnp.int32)

    out = decoder_embedding(responses, resp_table, pos_table)
    out = jax.block_until_ready(out)

    # Pure-JAX reference check of the exact forward semantics.
    ref = pos_table[None, :, :] + resp_table[responses]
    assert out.shape == (batch, seq_len, n_dims)
    assert jnp.allclose(out, ref, atol=1e-5, rtol=1e-5), "mismatch vs reference"

    print("KERNEL_OK")
</pallas_src>

<mosaic_0001>
module attributes {stable_mosaic.version = 11 : i64} {
  func.func @_decoder_embed_kernel(%arg0: i32, %arg1: memref<8x1xi32, #tpu.memory_space<vmem>>, %arg2: memref<4x32xf32, #tpu.memory_space<vmem>>, %arg3: memref<8x32xf32, #tpu.memory_space<vmem>>, %arg4: memref<8x32xf32, #tpu.memory_space<vmem>>) attributes {dimension_semantics = [#tpu.dimension_semantics<parallel>], iteration_bounds = array<i64: 2>, scalar_prefetch = 0 : i64, scratch_operands = 0 : i64, tpu.core_type = #tpu.core_type<tc>, window_params = [{transform_indices = @transform_0, window_bounds = array<i64: 8, 1>}, {pipeline_mode = #tpu.pipeline_mode<synchronous>, transform_indices = @transform_1, window_bounds = array<i64: 4, 32>}, {transform_indices = @transform_2, window_bounds = array<i64: 8, 32>}, {transform_indices = @transform_3, window_bounds = array<i64: 8, 32>}]} {
    %c0 = arith.constant 0 : index
    %c0_0 = arith.constant 0 : index
    %0 = vector.load %arg1[%c0, %c0_0] : memref<8x1xi32, #tpu.memory_space<vmem>>, vector<8x1xi32>
    %c0_1 = arith.constant 0 : index
    %c0_2 = arith.constant 0 : index
    %1 = vector.load %arg2[%c0_1, %c0_2] : memref<4x32xf32, #tpu.memory_space<vmem>>, vector<4x32xf32>
    %cst = arith.constant 0.000000e+00 : f32
    %2 = vector.broadcast %cst : f32 to vector<8x32xf32>
    %c0_i32 = arith.constant 0 : i32
    %3 = vector.broadcast %c0_i32 : i32 to vector<8x1xi32>
    %4 = arith.cmpi eq, %0, %3 : vector<8x1xi32>
    %5 = vector.extract_strided_slice %1 {offsets = [0, 0], sizes = [1, 32], strides = [1, 1]} : vector<4x32xf32> to vector<1x32xf32>
    %6 = vector.shape_cast %4 : vector<8x1xi1> to vector<8x1xi1>
    %7 = vector.broadcast %6 : vector<8x1xi1> to vector<8x32xi1>
    %8 = vector.shape_cast %5 : vector<1x32xf32> to vector<1x32xf32>
    %9 = vector.broadcast %8 : vector<1x32xf32> to vector<8x32xf32>
    %10 = arith.select %7, %9, %2 : vector<8x32xi1>, vector<8x32xf32>
    %c1_i32 = arith.constant 1 : i32
    %11 = vector.broadcast %c1_i32 : i32 to vector<8x1xi32>
    %12 = arith.cmpi eq, %0, %11 : vector<8x1xi32>
    %13 = vector.extract_strided_slice %1 {offsets = [1, 0], sizes = [1, 32], strides = [1, 1]} : vector<4x32xf32> to vector<1x32xf32>
    %14 = vector.shape_cast %12 : vector<8x1xi1> to vector<8x1xi1>
    %15 = vector.broadcast %14 : vector<8x1xi1> to vector<8x32xi1>
    %16 = vector.shape_cast %13 : vector<1x32xf32> to vector<1x32xf32>
    %17 = vector.broadcast %16 : vector<1x32xf32> to vector<8x32xf32>
    %18 = arith.select %15, %17, %10 : vector<8x32xi1>, vector<8x32xf32>
    %c2_i32 = arith.constant 2 : i32
    %19 = vector.broadcast %c2_i32 : i32 to vector<8x1xi32>
    %20 = arith.cmpi eq, %0, %19 : vector<8x1xi32>
    %21 = vector.extract_strided_slice %1 {offsets = [2, 0], sizes = [1, 32], strides = [1, 1]} : vector<4x32xf32> to vector<1x32xf32>
    %22 = vector.shape_cast %20 : vector<8x1xi1> to vector<8x1xi1>
    %23 = vector.broadcast %22 : vector<8x1xi1> to vector<8x32xi1>
    %24 = vector.shape_cast %21 : vector<1x32xf32> to vector<1x32xf32>
    %25 = vector.broadcast %24 : vector<1x32xf32> to vector<8x32xf32>
    %26 = arith.select %23, %25, %18 : vector<8x32xi1>, vector<8x32xf32>
    %c3_i32 = arith.constant 3 : i32
    %27 = vector.broadcast %c3_i32 : i32 to vector<8x1xi32>
    %28 = arith.cmpi eq, %0, %27 : vector<8x1xi32>
    %29 = vector.extract_strided_slice %1 {offsets = [3, 0], sizes = [1, 32], strides = [1, 1]} : vector<4x32xf32> to vector<1x32xf32>
    %30 = vector.shape_cast %28 : vector<8x1xi1> to vector<8x1xi1>
    %31 = vector.broadcast %30 : vector<8x1xi1> to vector<8x32xi1>
    %32 = vector.shape_cast %29 : vector<1x32xf32> to vector<1x32xf32>
    %33 = vector.broadcast %32 : vector<1x32xf32> to vector<8x32xf32>
    %34 = arith.select %31, %33, %26 : vector<8x32xi1>, vector<8x32xf32>
    %c0_3 = arith.constant 0 : index
    %c0_4 = arith.constant 0 : index
    %35 = vector.load %arg3[%c0_3, %c0_4] : memref<8x32xf32, #tpu.memory_space<vmem>>, vector<8x32xf32>
    %36 = arith.addf %35, %34 : vector<8x32xf32>
    %c0_5 = arith.constant 0 : index
    %c0_6 = arith.constant 0 : index
    %37 = vector.load %arg4[%c0_5, %c0_6] : memref<8x32xf32, #tpu.memory_space<vmem>>, vector<8x32xf32>
    tpu.vector_store %arg4[%c0_5, %c0_6], %36 {strides = array<i32>} : memref<8x32xf32, #tpu.memory_space<vmem>>, vector<8x32xf32>,
    return
  }
  func.func @transform_0(%arg0: i32) -> (i32, i32) {
    %c0_i32 = arith.constant 0 : i32
    %c0_i32_0 = arith.constant 0 : i32
    return %arg0, %c0_i32 : i32, i32
  }
  func.func @transform_1(%arg0: i32) -> (i32, i32) {
    %c0_i32 = arith.constant 0 : i32
    %c0_i32_0 = arith.constant 0 : i32
    %c0_i32_1 = arith.constant 0 : i32
    return %c0_i32, %c0_i32_0 : i32, i32
  }
  func.func @transform_2(%arg0: i32) -> (i32, i32) {
    %c1_i32 = arith.constant 1 : i32
    %c0_i32 = arith.constant 0 : i32
    %0 = arith.cmpi eq, %c1_i32, %c0_i32 : i32
    %c1_i32_0 = arith.constant 1 : i32
    %1 = arith.select %0, %c1_i32_0, %c1_i32 : i32
    %2 = arith.remsi %arg0, %1 : i32
    %c0_i32_1 = arith.constant 0 : i32
    %3 = arith.cmpi ne, %2, %c0_i32_1 : i32
    %c0_i32_2 = arith.constant 0 : i32
    %4 = arith.cmpi slt, %2, %c0_i32_2 : i32
    %c0_i32_3 = arith.constant 0 : i32
    %5 = arith.cmpi slt, %1, %c0_i32_3 : i32
    %6 = arith.xori %4, %5 : i1
    %7 = arith.andi %6, %3 : i1
    %8 = arith.addi %2, %1 : i32
    %9 = arith.select %7, %8, %2 : i32
    %c0_i32_4 = arith.constant 0 : i32
    %c0_i32_5 = arith.constant 0 : i32
    return %9, %c0_i32_4 : i32, i32
  }
  func.func @transform_3(%arg0: i32) -> (i32, i32) {
    %c0_i32 = arith.constant 0 : i32
    %c0_i32_0 = arith.constant 0 : i32
    return %arg0, %c0_i32 : i32, i32
  }
}

</mosaic_0001>

<bundles_post_ra>
// kernel: decoder_embedding.1
= control target key start
LH: loop header
LB: loop body
LE: loop exit
PB: predicated region body
PF: predicated region fallthrough
CT: control target
= control target key end

     0   :  { %8 = vsyncpa [#allocation3], 0  ;;  %s522_s0 = inlined_call_operand.vmem [shape: s32[16,1], index: 0, kind: input, shape index: {}]   ;;  %s523_s1 = inlined_call_operand.vmem [shape: f32[4,32], index: 1, kind: input, shape index: {}]   ;;  %s524_s2 = inlined_call_operand.vmem [shape: f32[8,32], index: 2, kind: input, shape index: {}]   ;;  %s525_s3 = inlined_call_operand.hbm [shape: f32[16,32], index: 3, kind: output, shape index: {}]  }
   0x1   :  { %10 = vsyncpa [#allocation3 + $0x1], 0  ;;  %s425_s12 = smov 0   ;;  %s427_s13 = smov 0  }
   0x2   :  { %s429_s14 = smov 0   ;;  %s431_s15 = smov 0  }
   0x3 LB: > { %s446_s16 = sadd.s32 4294967295, %s401_s15   ;;  %s289_s17 = sadd.s32 4294967294, %s401_s15   ;;  %s401_s15 = sphi %s431_s15, %s531_s15   ;;  %s397_s14 = sphi %s429_s14, %s530_s14   ;;  %s393_s13 = sphi %s427_s13, %s529_s13   ;;  %s389_s12 = sphi %s425_s12, %s528_s12  }
   0x4   : > { %s450_s18 = sadd.s32 1, %s401_s15   ;;  %s91_s19 = sadd.s32 1, %s397_s14 }
   0x5   : > { %s88_s20 = ssub.s32 %s401_s15, %s450_s18  ;;  %p101_p0 = scmp.ne.s32.totalorder %s397_s14, %s393_s13 }
   0x6   : > { %p89_p1 = scmp.eq.s32.totalorder %s88_s20, 0  ;;  %p102_p2 = scmp.eq.s32.totalorder %s446_s16, 1 }
   0x7   : > { %p107_p3 = scmp.ne.s32.totalorder %s393_s13, %s389_s12  ;;  %p108_p4 = scmp.eq.s32.totalorder %s289_s17, 1 }
   0x8   : > { %s461_s21 = scalar_select %p89_p1, %s397_s14, %s91_s19  }
   0x9   : > { %p463_p5 = por %p102_p2, %p101_p0  ;;  %p467_p6 = por %p108_p4, %p107_p3 }
   0xa   : > { %p292_p7 = scmp.ge.s32.totalorder %s401_s15, 1  ;;  %p139_p8 = scmp.lt.s32.totalorder %s401_s15, 3 }
   0xc   : > { %p140_p9 = pnand %p292_p7, %p139_p8 }
   0xd   : > { %p162_p10 = scmp.lt.s32.totalorder (!%p140_p9), %s446_s16, 1  ;;  %s159_s29 = sand.u32 (!%p140_p9), 1, %s393_s13  }
   0xe   : > { %143 = sbr.rel (%p140_p9) target bundleno = 173 (0xad), region = 32  ;;  %s293_s5 = sshll.u32 (!%p140_p9), %s159_s29, 3 }
   0xf   : > { %s296_s8 = sshll.u32 (!%p140_p9), %s446_s16, 7  ;;  %s161_s9 = scalar_lea.vmem (!%p140_p9), [#allocation2], %s293_s5 }
  0x10   : > { %s230_s10 = sshll.u32 (!%p140_p9), %s161_s9, 4  ;;  %s228_s19 = scalar_lea.hbm (!%p140_p9), %s525_s3, %s296_s8  ;;  %s231_s10 = int_to_ptr.vmem [resolvable:$true] %s230_s10 }
  0x11   : > { %s217_s20 = scalar_lea.sflag (!%p140_p9), [#allocation3], %s159_s29 }
  0x13   : > { %v403_v0 = vmov 0   ;;  %s163_s24 = scalar_select %p162_p10, %s446_s16, 1  ;;  %v174_v6 = vlaneseq  ;;  %v167_v9 = vld [vmem:[%s523_s1] sm:$0xf]  ;;  %vm214_vm8 = vcmask 261120  }
  0x14   : > { %340 = vset.pattern.permute.xlu1 %v403_v0  ;;  %339 = vset.pattern.permute.xlu0 %v403_v0  ;;  %v212_v22 = vld [vmem:[%s524_s2] sm:$0xff]  ;;  %s404_s16 = smov [#allocation2]  }
  0x15   : > { %s294_s25 = sshll.u32 %s163_s24, 3  ;;  %v175_v7 = vshrl.u32 %v174_v6, 7  ;;  %s341_s24 = scalar_lea.vmem %s231_s10, 128 }
  0x16   : > { %s165_s28 = scalar_lea.vmem %s522_s0, %s294_s25  ;;  %p342_p11 = scmp.ne.s32.totalorder %s231_s10, %s341_s24 }
  0x17   : > { %v166_v1 = vld [vmem:[%s165_s28] sm:$0xff]  ;;  %v176_v8 = vsub.s32 0, %v175_v7  ;;  %v187_v10 = vsub.s32 1, %v175_v7  ;;  %v198_v11 = vsub.s32 2, %v175_v7  ;;  %v209_v14 = vsub.s32 3, %v175_v7  ;;  %s345_s25 = sshll.u32 %s404_s16, 4  ;;  %s346_s25 = int_to_ptr.vmem [resolvable:$false] %s345_s25 }
  0x18   : > { %vm190_vm0 = vcmp.eq.s32.totalorder %v166_v1, 2  ;;  %vm168_vm1 = vcmp.eq.s32.totalorder %v166_v1, 0  ;;  %vm201_vm2 = vcmp.eq.s32.totalorder %v166_v1, 3  ;;  %vm179_vm3 = vcmp.eq.s32.totalorder %v166_v1, 1  ;;  %p343_p12 = pnand %p342_p11, %p463_p5  ;;  %s347_s26 = scalar_lea.vmem %s346_s25, 256 }
  0x19   : > { %v191_v2 = vsel %vm190_vm0, 1, %v403_v0  ;;  %v169_v3 = vsel %vm168_vm1, 1, %v403_v0  ;;  %v202_v4 = vsel %vm201_vm2, 1, %v403_v0  ;;  %v180_v5 = vsel %vm179_vm3, 1, %v403_v0  ;;  %p348_p0 = scmp.lt.s32.totalorder %s231_s10, %s346_s25  ;;  %p349_p1 = scmp.lt.s32.totalorder %s347_s26, %s341_s24 }
  0x1a   : > { %193 = vperm.xlu1 %340, %v191_v2   ;;  %171 = vperm.xlu0 %339, %v169_v3   ;;  %v177_v15 = vrot.slane %v167_v9, %v176_v8  ;;  %v188_v16 = vrot.slane %v167_v9, %v187_v10  ;;  %v199_v17 = vrot.slane %v167_v9, %v198_v11  ;;  %p344_p13 = pneg %p343_p12 }
  0x1b   : > { %v210_v19 = vrot.slane %v167_v9, %v209_v14  ;;  %p350_p2 = por %p349_p1, %p348_p0 }
  0x1d   : > { %p351_p3 = pnand %p350_p2, %p344_p13 }
  0x1e   : > { %204 = vperm.xlu1 %340, %v202_v4   ;;  %182 = vperm.xlu0 %339, %v180_v5  }
  0x95   : > { %v194_v12 = vpop.permute.xlu1 %193  ;;  %v172_v13 = vpop.permute.xlu0 %171 }
  0x96   : > { %vm173_vm4 = vcmp.eq.s32.totalorder %v172_v13, 1  ;;  %vm195_vm6 = vcmp.eq.s32.totalorder %v194_v12, 1 }
  0x97   : > { %v178_v21 = vsel %vm173_vm4, %v177_v15, 0.0 }
  0x99   : > { %v205_v18 = vpop.permute.xlu1 %204  ;;  %v183_v20 = vpop.permute.xlu0 %182 }
  0x9a   : > { %vm184_vm5 = vcmp.eq.s32.totalorder %v183_v20, 1  ;;  %vm206_vm7 = vcmp.eq.s32.totalorder %v205_v18, 1 }
  0x9b   : > { %v189_v23 = vsel %vm184_vm5, %v188_v16, %v178_v21 }
  0x9c   : > { %v200_v24 = vsel %vm195_vm6, %v199_v17, %v189_v23 }
  0x9d   : > { %v211_v25 = vsel %vm206_vm7, %v210_v19, %v200_v24 }
  0x9e   : > { %v213_v26 = vadd.f32 %v212_v22, %v211_v25 }
  0xa0   : > { %215 = vst.msk [vmem:[%s161_s9] sm:$0xff] %vm214_vm8, %v213_v26 }
  0xa1   : > { %354 = shalt.err (!%p351_p3)
}
  0xa2   : > { %s355_s27 = scalar_lea.hbm %s228_s19, 128  ;;  %s359_s30 = scalar_lea.hbm %s525_s3, 256 }
  0xa3   : > { %p356_p4 = scmp.ne.s32.totalorder %s228_s19, %s355_s27  ;;  %p360_p9 = scmp.lt.s32.totalorder %s228_s19, %s525_s3 }
  0xa4   : > { %p361_p10 = scmp.lt.s32.totalorder %s359_s30, %s355_s27 }
  0xa5   : > { %p357_p7 = pnand %p356_p4, %p463_p5 }
  0xa6   : > { %p362_p11 = por %p361_p10, %p360_p9 }
  0xa7   : > { %p358_p8 = pneg %p357_p7 }
  0xa9   : > { %p363_p12 = pnand %p362_p11, %p358_p8 }
  0xab   : > { %366 = shalt.err (!%p363_p12)
}
  0xac   : > { %299 = dma.vmem_to_hbm [thread:$0]  (%p463_p5), %s231_s10, 128, %s228_s19, %s217_s20  }
  0xad PF: > { %p305_p13 = scmp.ge.s32.totalorder %s401_s15, 2  ;;  %s242_s6 = sand.u32 1, %s389_s12  }
  0xae   : > { %s243_s7 = scalar_lea.sflag [#allocation3], %s242_s6 }
  0xaf   : > { %p302_p0 = pnand %p305_p13, %p467_p6 }
  0xb1   : > { %p303_p1 = pneg %p302_p0 }
  0xb3   : > { %384 = dma.done.wait (%p303_p1), %s243_s7, 128  }
  0xb4   : > { %386 = vsyncadd (%p303_p1), %s243_s7, 4294967168  ;;  %p13_p2 = scmp.ge.s32.totalorder %s450_s18, 4   ;;  %s528_s12 = smov %s393_s13 }
  0xb5   : > { %s529_s13 = smov %s397_s14  ;;  %s530_s14 = smov %s461_s21 }
  0xb6   : > { %s531_s15 = smov %s450_s18  ;;  %15 = sbr.rel (!%p13_p2) target bundleno = 3 (0x3), region = 67 }
  0xbb   :  { %248 = vsyncpa [#allocation3], 1 }
  0xbc   :  { %250 = vsyncpa [#allocation3 + $0x1], 1 }

</bundles_post_ra>
